<compile_context>
chip_gen: v7x
topology: tpu7x:2x2x1
jax: 0.10.0
libtpu: 0.0.40
codegen_flags: <defaults>
</compile_context>

<pallas_src>
import math

import jax
import jax.numpy as jnp
from jax.experimental import pallas as pl
from jax.experimental.pallas import tpu as pltpu


def _round_up(x, m):
    return ((x + m - 1) // m) * m


# VMEM budget gating the "support fully resident" stage-2 layout.  Sized with
# headroom against v7x (64 MiB physical, 32 MiB scoped default); v5e/v6e have
# 128 MiB physical so this is conservative everywhere.
_RESIDENT_VMEM_BUDGET = 40 << 20
_VMEM_LIMIT_CAP = 48 << 20      # explicit vmem_limit_bytes cap (< v7x physical)
_STAGE2_TM = 512                # output row-block
_STAGE2_TK = 2048               # contraction tile when support is streamed
_STAGE1_TM_MAX = 2048           # stage-1 row tile (compute there is negligible)


def _tile_plan(n_nodes, f_out):
    """Pure function of problem size -> padded shapes + tiles.

    Shared by prepare_adjacency() and graph_convolution() so the padded adj
    layout is fixed and the cast/pad can be hoisted out of the per-call path.
    """
    f_out_pad = _round_up(f_out, 128)      # lane-dense output, filled MXU N dim
    n_pad = _round_up(n_nodes, 128)        # adj cols == support rows

    tm = min(_STAGE2_TM, n_pad)
    # VMEM estimate for the resident-support layout: resident support slab +
    # double-buffered adj row-block + double-buffered f32 output tile + bias.
    resident_bytes = (n_pad * f_out_pad * 2
                      + 2 * tm * n_pad * 2
                      + 2 * tm * f_out_pad * 4
                      + f_out_pad * 4)
    resident = resident_bytes <= _RESIDENT_VMEM_BUDGET
    if resident:
        tk = n_pad                          # full contraction, no K grid axis
        n_pad_k = n_pad
    else:
        tk = min(_STAGE2_TK, n_pad)
        n_pad_k = _round_up(n_pad, tk)
    n_pad_m = _round_up(n_pad, tm)          # adj rows == output rows

    # Stage-1 row tile: largest 128-multiple (<= _STAGE1_TM_MAX) dividing n_pad_k.
    tms = 128
    for cand in (_STAGE1_TM_MAX, 1024, 512, 256):
        if n_pad_k % cand == 0:
            tms = cand
            break

    return dict(f_out_pad=f_out_pad, n_pad_k=n_pad_k, n_pad_m=n_pad_m,
                tm=tm, tk=tk, tms=tms, resident=resident,
                resident_bytes=resident_bytes)


def prepare_adjacency(adj, f_out, dtype=jnp.bfloat16):
    """Cast + zero-pad the adjacency ONCE (hoisted out of the per-layer path).

    GCN adjacency is constant across layers and training steps; re-casting it
    every forward roughly triples adj-related HBM traffic on an adj-bound
    kernel.  Returns a [n_pad_m, n_pad_k] bf16 array matching the tile plan.
    """
    n = adj.shape[0]
    p = _tile_plan(n, f_out)
    adj_p = jnp.zeros((p["n_pad_m"], p["n_pad_k"]), dtype)
    return adj_p.at[:n, :n].set(adj.astype(dtype))


# ---------------------------------------------------------------------------
# Stage 1: support = X @ W   (row-tiled; bf16 output feeds stage-2 MXU)
# ---------------------------------------------------------------------------
def _support_kernel(x_ref, w_ref, o_ref):
    o_ref[...] = jnp.dot(
        x_ref[...], w_ref[...], preferred_element_type=jnp.float32
    ).astype(o_ref.dtype)


# ---------------------------------------------------------------------------
# Stage 2a: out = A @ support + bias  (support fully VMEM-resident, no K axis)
# ---------------------------------------------------------------------------
def _aggregate_resident_kernel(adj_ref, s_ref, b_ref, o_ref):
    o_ref[...] = jnp.dot(
        adj_ref[...], s_ref[...], preferred_element_type=jnp.float32
    ) + b_ref[...]


# ---------------------------------------------------------------------------
# Stage 2b: out = A @ support + bias  (streamed K; accumulate directly in o_ref)
# ---------------------------------------------------------------------------
def _aggregate_streamed_kernel(adj_ref, s_ref, b_ref, o_ref):
    k = pl.program_id(1)

    @pl.when(k == 0)
    def _():
        # Output block is revisited across k (f32, resident in VMEM): seed it
        # with the broadcast bias instead of keeping a separate scratch acc.
        o_ref[...] = jnp.broadcast_to(b_ref[...], o_ref.shape)

    o_ref[...] += jnp.dot(
        adj_ref[...], s_ref[...], preferred_element_type=jnp.float32
    )


def graph_convolution(x, adj, weight, bias=None):
    """GCN forward: adj @ (x @ weight) + bias.

    x:      [N, F_in] node features.
    adj:    either the raw [N, N] dense normalized adjacency, or (preferred)
            the output of prepare_adjacency() so the cast/pad is hoisted.
    weight: [F_in, F_out]; bias: [F_out] or None (with_bias=False).
    Returns [N, F_out] float32.
    """
    N, f_in = x.shape
    f_out = weight.shape[1]
    p = _tile_plan(N, f_out)
    f_out_pad, n_pad_k, n_pad_m = p["f_out_pad"], p["n_pad_k"], p["n_pad_m"]
    tm, tk, tms = p["tm"], p["tk"], p["tms"]

    if adj.shape == (n_pad_m, n_pad_k) and adj.dtype == jnp.bfloat16:
        adj_p = adj                       # already prepared / hoisted
    else:
        adj_p = prepare_adjacency(adj, f_out)   # fallback; prefer hoisting

    # bf16 MXU inputs, f32 accumulation.
    x_p = jnp.zeros((n_pad_k, f_in), jnp.bfloat16).at[:N, :].set(
        x.astype(jnp.bfloat16))
    w_p = jnp.zeros((f_in, f_out_pad), jnp.bfloat16).at[:, :f_out].set(
        weight.astype(jnp.bfloat16))
    if bias is None:
        b_p = jnp.zeros((1, f_out_pad), jnp.float32)
    else:
        b_p = jnp.zeros((1, f_out_pad), jnp.float32).at[0, :f_out].set(
            bias.astype(jnp.float32))

    # ---- stage 1: support = X @ W  (F_in kept as a full block: it is small) --
    support = pl.pallas_call(
        _support_kernel,
        out_shape=jax.ShapeDtypeStruct((n_pad_k, f_out_pad), jnp.bfloat16),
        grid_spec=pltpu.PrefetchScalarGridSpec(
            num_scalar_prefetch=0,
            grid=(n_pad_k // tms,),
            in_specs=[
                pl.BlockSpec((tms, f_in), lambda i: (i, 0)),
                pl.BlockSpec((f_in, f_out_pad), lambda i: (0, 0)),
            ],
            out_specs=pl.BlockSpec((tms, f_out_pad), lambda i: (i, 0)),
        ),
        compiler_params=pltpu.CompilerParams(
            dimension_semantics=("parallel",)),
        cost_estimate=pl.CostEstimate(
            flops=2 * n_pad_k * f_in * f_out_pad,
            transcendentals=0,
            bytes_accessed=(x_p.size * 2 + w_p.size * 2
                            + n_pad_k * f_out_pad * 2)),
    )(x_p, w_p)

    # ---- stage 2: out = A @ support + bias -----------------------------------
    if p["resident"]:
        # Support slab stays in VMEM across all row-blocks: adj and support are
        # each read from HBM exactly once.
        vmem_limit = int(min(max(p["resident_bytes"] + (4 << 20), 16 << 20),
                             _VMEM_LIMIT_CAP))
        out = pl.pallas_call(
            _aggregate_resident_kernel,
            out_shape=jax.ShapeDtypeStruct((n_pad_m, f_out_pad), jnp.float32),
            grid_spec=pltpu.PrefetchScalarGridSpec(
                num_scalar_prefetch=0,
                grid=(n_pad_m // tm,),
                in_specs=[
                    pl.BlockSpec((tm, n_pad_k), lambda i: (i, 0)),        # adj row-block
                    pl.BlockSpec((n_pad_k, f_out_pad), lambda i: (0, 0)), # resident support
                    pl.BlockSpec((1, f_out_pad), lambda i: (0, 0)),       # resident bias
                ],
                out_specs=pl.BlockSpec((tm, f_out_pad), lambda i: (i, 0)),
            ),
            compiler_params=pltpu.CompilerParams(
                dimension_semantics=("parallel",),
                vmem_limit_bytes=vmem_limit),
            cost_estimate=pl.CostEstimate(
                flops=2 * n_pad_m * n_pad_k * f_out_pad,
                transcendentals=0,
                bytes_accessed=(adj_p.size * 2
                                + n_pad_k * f_out_pad * 2
                                + n_pad_m * f_out_pad * 4
                                + f_out_pad * 4)),
        )(adj_p, support, b_p)
    else:
        # Streamed fallback for very large graphs: big tiles, K on a trailing
        # "arbitrary" axis, direct f32 accumulation into the output block.
        n_row_blocks = n_pad_m // tm
        footprint = (2 * tm * tk * 2 + 2 * tk * f_out_pad * 2
                     + 2 * tm * f_out_pad * 4 + f_out_pad * 4)
        vmem_limit = int(min(max(footprint + (4 << 20), 16 << 20),
                             _VMEM_LIMIT_CAP))
        out = pl.pallas_call(
            _aggregate_streamed_kernel,
            out_shape=jax.ShapeDtypeStruct((n_pad_m, f_out_pad), jnp.float32),
            grid_spec=pltpu.PrefetchScalarGridSpec(
                num_scalar_prefetch=0,
                grid=(n_pad_m // tm, n_pad_k // tk),
                in_specs=[
                    pl.BlockSpec((tm, tk), lambda i, k: (i, k)),          # adj tile
                    pl.BlockSpec((tk, f_out_pad), lambda i, k: (k, 0)),   # support tile
                    pl.BlockSpec((1, f_out_pad), lambda i, k: (0, 0)),    # resident bias
                ],
                out_specs=pl.BlockSpec((tm, f_out_pad), lambda i, k: (i, 0)),
            ),
            compiler_params=pltpu.CompilerParams(
                dimension_semantics=("parallel", "arbitrary"),
                vmem_limit_bytes=vmem_limit),
            cost_estimate=pl.CostEstimate(
                flops=2 * n_pad_m * n_pad_k * f_out_pad,
                transcendentals=0,
                # support IS re-streamed once per row-block in this layout.
                bytes_accessed=(adj_p.size * 2
                                + n_row_blocks * n_pad_k * f_out_pad * 2
                                + n_pad_m * f_out_pad * 4
                                + f_out_pad * 4)),
        )(adj_p, support, b_p)

    return out[:N, :f_out]


if __name__ == "__main__":
    key = jax.random.PRNGKey(0)
    k_x, k_adj, k_w, k_b = jax.random.split(key, 4)

    # Small synthetic GCN problem.
    N = 128          # number of graph nodes
    in_features = 64
    out_features = 32

    # Deterministic parameter init matching reset_parameters():
    # uniform(-stdv, stdv) with stdv = 1/sqrt(out_features).
    stdv = 1.0 / math.sqrt(out_features)
    weight = jax.random.uniform(
        k_w, (in_features, out_features), jnp.float32, minval=-stdv, maxval=stdv)
    bias = jax.random.uniform(
        k_b, (out_features,), jnp.float32, minval=-stdv, maxval=stdv)

    # Inputs: dense node features and a (dense) normalized adjacency.
    x = jax.random.normal(k_x, (N, in_features), jnp.float32)
    adj_raw = jax.random.uniform(k_adj, (N, N), jnp.float32)
    adj = jnp.where(adj_raw > 0.9, adj_raw, 0.0)          # sparse-ish dense adjacency
    adj = adj + jnp.eye(N, dtype=jnp.float32)              # self loops
    adj = adj / jnp.sum(adj, axis=1, keepdims=True)        # row-normalize

    # Hoisted once: adjacency is constant across GCN layers / training steps.
    adj_prep = prepare_adjacency(adj, out_features)

    fwd = jax.jit(graph_convolution)
    out = jax.block_until_ready(fwd(x, adj_prep, weight, bias))

    # Reference check in plain JAX (f32). Kernel uses bf16 MXU inputs with f32
    # accumulation, so tolerance is relaxed accordingly.
    ref = adj @ (x @ weight) + bias[None, :]
    assert out.shape == (N, out_features)
    assert jnp.allclose(out, ref, atol=2e-2, rtol=2e-2), "mismatch vs reference"

    print("KERNEL_OK")
</pallas_src>

<mosaic_0001>
module attributes {stable_mosaic.version = 11 : i64} {
  func.func @_support_kernel(%arg0: i32, %arg1: memref<128x64xbf16, #tpu.memory_space<vmem>>, %arg2: memref<64x128xbf16, #tpu.memory_space<vmem>>, %arg3: memref<128x128xbf16, #tpu.memory_space<vmem>>) attributes {dimension_semantics = [#tpu.dimension_semantics<parallel>], iteration_bounds = array<i64: 1>, scalar_prefetch = 0 : i64, scratch_operands = 0 : i64, tpu.core_type = #tpu.core_type<tc>, window_params = [{transform_indices = @transform_0, window_bounds = array<i64: 128, 64>}, {pipeline_mode = #tpu.pipeline_mode<synchronous>, transform_indices = @transform_1, window_bounds = array<i64: 64, 128>}, {transform_indices = @transform_2, window_bounds = array<i64: 128, 128>}]} {
    %c0 = arith.constant 0 : index
    %c0_0 = arith.constant 0 : index
    %0 = vector.load %arg1[%c0, %c0_0] : memref<128x64xbf16, #tpu.memory_space<vmem>>, vector<128x64xbf16>
    %c0_1 = arith.constant 0 : index
    %c0_2 = arith.constant 0 : index
    %1 = vector.load %arg2[%c0_1, %c0_2] : memref<64x128xbf16, #tpu.memory_space<vmem>>, vector<64x128xbf16>
    %cst = arith.constant dense<0.000000e+00> : vector<128x128xf32>
    %2 = tpu.matmul %0, %1, %cst {dimension_numbers = #tpu.dot_dimension_numbers<[1], [0], [0], [1], [0, 0, 1, 1], [], []>} : vector<128x64xbf16>, vector<64x128xbf16>, vector<128x128xf32> -> vector<128x128xf32>
    %3 = arith.truncf %2 : vector<128x128xf32> to vector<128x128xbf16>
    %c0_3 = arith.constant 0 : index
    %c0_4 = arith.constant 0 : index
    %4 = vector.load %arg3[%c0_3, %c0_4] : memref<128x128xbf16, #tpu.memory_space<vmem>>, vector<128x128xbf16>
    tpu.vector_store %arg3[%c0_3, %c0_4], %3 {strides = array<i32>} : memref<128x128xbf16, #tpu.memory_space<vmem>>, vector<128x128xbf16>,
    return
  }
  func.func @transform_0(%arg0: i32) -> (i32, i32) {
    %c0_i32 = arith.constant 0 : i32
    %c0_i32_0 = arith.constant 0 : i32
    return %arg0, %c0_i32 : i32, i32
  }
  func.func @transform_1(%arg0: i32) -> (i32, i32) {
    %c0_i32 = arith.constant 0 : i32
    %c0_i32_0 = arith.constant 0 : i32
    %c0_i32_1 = arith.constant 0 : i32
    return %c0_i32, %c0_i32_0 : i32, i32
  }
  func.func @transform_2(%arg0: i32) -> (i32, i32) {
    %c0_i32 = arith.constant 0 : i32
    %c0_i32_0 = arith.constant 0 : i32
    return %arg0, %c0_i32 : i32, i32
  }
}

module attributes {stable_mosaic.version = 11 : i64} {
  func.func @_aggregate_resident_kernel(%arg0: i32, %arg1: memref<128x128xbf16, #tpu.memory_space<vmem>>, %arg2: memref<128x128xbf16, #tpu.memory_space<vmem>>, %arg3: memref<1x128xf32, #tpu.memory_space<vmem>>, %arg4: memref<128x128xf32, #tpu.memory_space<vmem>>) attributes {dimension_semantics = [#tpu.dimension_semantics<parallel>], iteration_bounds = array<i64: 1>, scalar_prefetch = 0 : i64, scratch_operands = 0 : i64, tpu.core_type = #tpu.core_type<tc>, window_params = [{transform_indices = @transform_0, window_bounds = array<i64: 128, 128>}, {pipeline_mode = #tpu.pipeline_mode<synchronous>, transform_indices = @transform_1, window_bounds = array<i64: 128, 128>}, {pipeline_mode = #tpu.pipeline_mode<synchronous>, transform_indices = @transform_2, window_bounds = array<i64: 1, 128>}, {transform_indices = @transform_3, window_bounds = array<i64: 128, 128>}]} {
    %c0 = arith.constant 0 : index
    %c0_0 = arith.constant 0 : index
    %0 = vector.load %arg1[%c0, %c0_0] : memref<128x128xbf16, #tpu.memory_space<vmem>>, vector<128x128xbf16>
    %c0_1 = arith.constant 0 : index
    %c0_2 = arith.constant 0 : index
    %1 = vector.load %arg2[%c0_1, %c0_2] : memref<128x128xbf16, #tpu.memory_space<vmem>>, vector<128x128xbf16>
    %cst = arith.constant dense<0.000000e+00> : vector<128x128xf32>
    %2 = tpu.matmul %0, %1, %cst {dimension_numbers = #tpu.dot_dimension_numbers<[1], [0], [0], [1], [0, 0, 1, 1], [], []>} : vector<128x128xbf16>, vector<128x128xbf16>, vector<128x128xf32> -> vector<128x128xf32>
    %c0_3 = arith.constant 0 : index
    %c0_4 = arith.constant 0 : index
    %3 = vector.load %arg3[%c0_3, %c0_4] : memref<1x128xf32, #tpu.memory_space<vmem>>, vector<1x128xf32>
    %4 = vector.broadcast %3 : vector<1x128xf32> to vector<128x128xf32>
    %5 = arith.addf %2, %4 : vector<128x128xf32>
    %c0_5 = arith.constant 0 : index
    %c0_6 = arith.constant 0 : index
    %6 = vector.load %arg4[%c0_5, %c0_6] : memref<128x128xf32, #tpu.memory_space<vmem>>, vector<128x128xf32>
    tpu.vector_store %arg4[%c0_5, %c0_6], %5 {strides = array<i32>} : memref<128x128xf32, #tpu.memory_space<vmem>>, vector<128x128xf32>,
    return
  }
  func.func @transform_0(%arg0: i32) -> (i32, i32) {
    %c0_i32 = arith.constant 0 : i32
    %c0_i32_0 = arith.constant 0 : i32
    return %arg0, %c0_i32 : i32, i32
  }
  func.func @transform_1(%arg0: i32) -> (i32, i32) {
    %c0_i32 = arith.constant 0 : i32
    %c0_i32_0 = arith.constant 0 : i32
    %c0_i32_1 = arith.constant 0 : i32
    return %c0_i32, %c0_i32_0 : i32, i32
  }
  func.func @transform_2(%arg0: i32) -> (i32, i32) {
    %c0_i32 = arith.constant 0 : i32
    %c0_i32_0 = arith.constant 0 : i32
    %c0_i32_1 = arith.constant 0 : i32
    return %c0_i32, %c0_i32_0 : i32, i32
  }
  func.func @transform_3(%arg0: i32) -> (i32, i32) {
    %c0_i32 = arith.constant 0 : i32
    %c0_i32_0 = arith.constant 0 : i32
    return %arg0, %c0_i32 : i32, i32
  }
}

</mosaic_0001>

<bundles_post_ra>
// kernel: graph_convolution.2
= control target key start
LH: loop header
LB: loop body
LE: loop exit
PB: predicated region body
PF: predicated region fallthrough
CT: control target
= control target key end

     0   :  { %vm100_vm0 = vcmask 523264   ;;  %s544_s1 = inlined_call_operand.vmem [shape: bf16[64,128], index: 1, kind: input, shape index: {}]   ;;  %s545_s0 = inlined_call_operand.vmem [shape: bf16[128,64], index: 0, kind: input, shape index: {}]   ;;  %s546_s2 = inlined_call_operand.vmem [shape: bf16[128,128], index: 2, kind: output, shape index: {}]  }
   0x1   :  { %v449_v0 = vld [vmem:[%s544_s1] sm:$0xff]   ;;  %v450_v1 = vld [vmem:[%s544_s1 + $0x8] sm:$0xff]   ;;  %v451_v2 = vld [vmem:[%s544_s1 + $0x10] sm:$0xff]  }
   0x2   :  { %417 = vmatprep.subr.bf16.mxu0 %v449_v0  ;;  %441 = vmatprep.subr.bf16.mxu1 %v449_v0  ;;  %v453_v3 = vld [vmem:[%s545_s0] sm:$0xff]   ;;  %v452_v5 = vld [vmem:[%s544_s1 + $0x18] sm:$0xff]   ;;  %v455_v6 = vld [vmem:[%s545_s0 + $0x8] sm:$0xff]  }
   0x3   :  { %418 = vmatpush3.bf16.msra.mxu0 %v449_v0  ;;  %445 = vmatpush3.bf16.msra.mxu1 %v449_v0  ;;  %v454_v4 = vld [vmem:[%s545_s0 + $0x20] sm:$0xff]   ;;  %v456_v7 = vld [vmem:[%s545_s0 + $0x28] sm:$0xff]   ;;  %v457_v8 = vld [vmem:[%s545_s0 + $0x10] sm:$0xff]  }
   0x4   :  { %419 = vmatprep.subr.bf16.mxu0 %v450_v1  ;;  %442 = vmatprep.subr.bf16.mxu1 %v450_v1  ;;  %v458_v9 = vld [vmem:[%s545_s0 + $0x30] sm:$0xff]   ;;  %v459_v10 = vld [vmem:[%s545_s0 + $0x18] sm:$0xff]  }
   0x5   :  { %425 = vmatprep.mubr.msk.bf16.mxu0 %vm100_vm0, %v453_v3  ;;  %433 = vmatprep.mubr.msk.bf16.mxu1 %vm100_vm0, %v454_v4  ;;  %v460_v11 = vld [vmem:[%s545_s0 + $0x38] sm:$0xff]  }
   0x7   :  { %420 = vmatpush3.bf16.msra.mxu0 %v450_v1  ;;  %446 = vmatpush3.bf16.msra.mxu1 %v450_v1 }
   0x8   :  { %421 = vmatprep.subr.bf16.mxu0 %v451_v2  ;;  %443 = vmatprep.subr.bf16.mxu1 %v451_v2 }
   0xb   :  { %422 = vmatpush3.bf16.msra.mxu0 %v451_v2  ;;  %447 = vmatpush3.bf16.msra.mxu1 %v451_v2 }
   0xc   :  { %423 = vmatprep.subr.bf16.mxu0 %v452_v5  ;;  %444 = vmatprep.subr.bf16.mxu1 %v452_v5 }
   0xf   :  { %424 = vmatpush3.bf16.msra.mxu0 %v452_v5  ;;  %448 = vmatpush3.bf16.msra.mxu1 %v452_v5 }
  0x12   :  { %426 = vmatmul.mubr.msk.bf16.vlgmr.msra.gmra.mrb[0].mxu0 %vm100_vm0, %v455_v6  ;;  %434 = vmatmul.mubr.msk.bf16.vlgmr.msra.gmra.mrb[0].mxu1 %vm100_vm0, %v456_v7 }
  0x13   :  { %429 = vmatprep.mubr.msk.bf16.mxu0 %vm100_vm0, %v457_v8  ;;  %437 = vmatprep.mubr.msk.bf16.mxu1 %vm100_vm0, %v458_v9 }
  0x1a   :  { %430 = vmatmul.mubr.msk.bf16.gmra.mrb[4].mxu0 %vm100_vm0, %v459_v10  ;;  %438 = vmatmul.mubr.msk.bf16.gmra.mrb[4].mxu1 %vm100_vm0, %v460_v11 }
  0xe5   :  { %v427_v12 = vpop.f32.mrb[0].mxu0  ;;  %v435_v13 = vpop.f32.mrb[0].mxu1 }
  0xe6   :  { %v159_v14 = vpop.f32.mrb[1].mxu0  ;;  %v191_v15 = vpop.f32.mrb[1].mxu1 }
  0xe7   :  { %v428_v16 = vpop.f32.mrb[2].mxu0  ;;  %v436_v17 = vpop.f32.mrb[2].mxu1 }
  0xe8   :  { %v366_v18 = vpack.c.bf16 %v428_v16, %v427_v12  ;;  %v386_v19 = vpack.c.bf16 %v436_v17, %v435_v13  ;;  %v162_v20 = vpop.f32.mrb[3].mxu0  ;;  %v194_v21 = vpop.f32.mrb[3].mxu1 }
  0xe9   :  { %v361_v22 = vpack.c.bf16 %v162_v20, %v159_v14  ;;  %v381_v23 = vpack.c.bf16 %v194_v21, %v191_v15 }
  0xea   :  { %398 = vst [vmem:[%s546_s2 + $0x8] sm:$0xff] %v366_v18   ;;  %402 = vst [vmem:[%s546_s2 + $0x28] sm:$0xff] %v386_v19  }
  0xeb   :  { %362 = vst [vmem:[%s546_s2] sm:$0xff] %v361_v22   ;;  %401 = vst [vmem:[%s546_s2 + $0x20] sm:$0xff] %v381_v23  }
  0xed   :  { %v431_v24 = vpop.f32.mrb[4].mxu0  ;;  %v439_v25 = vpop.f32.mrb[4].mxu1 }
  0xee   :  { %v175_v26 = vpop.f32.mrb[5].mxu0  ;;  %v207_v27 = vpop.f32.mrb[5].mxu1 }
  0xef   :  { %v432_v28 = vpop.f32.mrb[6].mxu0  ;;  %v440_v29 = vpop.f32.mrb[6].mxu1 }
  0xf0   :  { %v376_v30 = vpack.c.bf16 %v432_v28, %v431_v24  ;;  %v396_v31 = vpack.c.bf16 %v440_v29, %v439_v25  ;;  %v178_v32 = vpop.f32.mrb[7].mxu0  ;;  %v210_v33 = vpop.f32.mrb[7].mxu1 }
  0xf1   :  { %v371_v34 = vpack.c.bf16 %v178_v32, %v175_v26  ;;  %v391_v35 = vpack.c.bf16 %v210_v33, %v207_v27 }
  0xf2   :  { %400 = vst [vmem:[%s546_s2 + $0x18] sm:$0xff] %v376_v30   ;;  %404 = vst [vmem:[%s546_s2 + $0x38] sm:$0xff] %v396_v31  }
  0xf3   :  { %399 = vst [vmem:[%s546_s2 + $0x10] sm:$0xff] %v371_v34   ;;  %403 = vst [vmem:[%s546_s2 + $0x30] sm:$0xff] %v391_v35  }

// kernel: graph_convolution.3
= control target key start
LH: loop header
LB: loop body
LE: loop exit
PB: predicated region body
PF: predicated region fallthrough
CT: control target
= control target key end

     0   :  { %s483_s1 = inlined_call_operand.vmem [shape: bf16[128,128], index: 1, kind: input, shape index: {}]   ;;  %s484_s0 = inlined_call_operand.vmem [shape: bf16[128,128], index: 0, kind: input, shape index: {}]   ;;  %s485_s2 = inlined_call_operand.vmem [shape: f32[1,128], index: 2, kind: input, shape index: {}]   ;;  %s486_s3 = inlined_call_operand.vmem [shape: f32[128,128], index: 3, kind: output, shape index: {}]  }
   0x1   :  { %v348_v0 = vld [vmem:[%s483_s1] sm:$0xff]   ;;  %v349_v1 = vld [vmem:[%s483_s1 + $0x8] sm:$0xff]   ;;  %v350_v2 = vld [vmem:[%s483_s1 + $0x10] sm:$0xff]  }
   0x2   :  { %300 = vmatprep.subr.bf16.mxu0 %v348_v0  ;;  %332 = vmatprep.subr.bf16.mxu1 %v348_v0  ;;  %v351_v3 = vld [vmem:[%s483_s1 + $0x18] sm:$0xff]   ;;  %v356_v4 = vld [vmem:[%s484_s0] sm:$0xff]   ;;  %v353_v7 = vld [vmem:[%s483_s1 + $0x28] sm:$0xff]  }
   0x3   :  { %301 = vmatpush3.bf16.msra.mxu0 %v348_v0  ;;  %340 = vmatpush3.bf16.msra.mxu1 %v348_v0  ;;  %v357_v5 = vld [vmem:[%s484_s0 + $0x20] sm:$0xff]   ;;  %v354_v8 = vld [vmem:[%s483_s1 + $0x30] sm:$0xff]   ;;  %v355_v9 = vld [vmem:[%s483_s1 + $0x38] sm:$0xff]  }
   0x4   :  { %302 = vmatprep.subr.bf16.mxu0 %v349_v1  ;;  %333 = vmatprep.subr.bf16.mxu1 %v349_v1  ;;  %v352_v6 = vld [vmem:[%s483_s1 + $0x20] sm:$0xff]   ;;  %v358_v10 = vld [vmem:[%s484_s0 + $0x8] sm:$0xff]   ;;  %v360_v12 = vld [vmem:[%s484_s0 + $0x10] sm:$0xff]  }
   0x5   :  { %316 = vmatprep.mubr.bf16.mxu0 %v356_v4  ;;  %324 = vmatprep.mubr.bf16.mxu1 %v357_v5  ;;  %v359_v11 = vld [vmem:[%s484_s0 + $0x28] sm:$0xff]   ;;  %v361_v13 = vld [vmem:[%s484_s0 + $0x30] sm:$0xff]   ;;  %v362_v14 = vld [vmem:[%s484_s0 + $0x18] sm:$0xff]  }
   0x6   :  { %v363_v15 = vld [vmem:[%s484_s0 + $0x38] sm:$0xff]   ;;  %v267_v16 = vld [vmem:[%s485_s2] ss:$0 sm:$0xff] }
   0x7   :  { %303 = vmatpush3.bf16.msra.mxu0 %v349_v1  ;;  %341 = vmatpush3.bf16.msra.mxu1 %v349_v1 }
   0x8   :  { %304 = vmatprep.subr.bf16.mxu0 %v350_v2  ;;  %334 = vmatprep.subr.bf16.mxu1 %v350_v2 }
   0xb   :  { %305 = vmatpush3.bf16.msra.mxu0 %v350_v2  ;;  %342 = vmatpush3.bf16.msra.mxu1 %v350_v2 }
   0xc   :  { %306 = vmatprep.subr.bf16.mxu0 %v351_v3  ;;  %335 = vmatprep.subr.bf16.mxu1 %v351_v3 }
   0xf   :  { %307 = vmatpush3.bf16.msra.mxu0 %v351_v3  ;;  %343 = vmatpush3.bf16.msra.mxu1 %v351_v3 }
  0x10   :  { %308 = vmatprep.subr.bf16.mxu0 %v352_v6  ;;  %336 = vmatprep.subr.bf16.mxu1 %v352_v6 }
  0x13   :  { %309 = vmatpush3.bf16.msra.mxu0 %v352_v6  ;;  %344 = vmatpush3.bf16.msra.mxu1 %v352_v6 }
  0x14   :  { %310 = vmatprep.subr.bf16.mxu0 %v353_v7  ;;  %337 = vmatprep.subr.bf16.mxu1 %v353_v7 }
  0x17   :  { %311 = vmatpush3.bf16.msra.mxu0 %v353_v7  ;;  %345 = vmatpush3.bf16.msra.mxu1 %v353_v7 }
  0x18   :  { %312 = vmatprep.subr.bf16.mxu0 %v354_v8  ;;  %338 = vmatprep.subr.bf16.mxu1 %v354_v8 }
  0x1b   :  { %313 = vmatpush3.bf16.msra.mxu0 %v354_v8  ;;  %346 = vmatpush3.bf16.msra.mxu1 %v354_v8 }
  0x1c   :  { %314 = vmatprep.subr.bf16.mxu0 %v355_v9  ;;  %339 = vmatprep.subr.bf16.mxu1 %v355_v9 }
  0x1f   :  { %315 = vmatpush3.bf16.msra.mxu0 %v355_v9  ;;  %347 = vmatpush3.bf16.msra.mxu1 %v355_v9 }
  0x22   :  { %317 = vmatmul.mubr.bf16.vlgmr.msra.gmra.mrb[0].mxu0 %v358_v10  ;;  %325 = vmatmul.mubr.bf16.vlgmr.msra.gmra.mrb[0].mxu1 %v359_v11 }
  0x23   :  { %320 = vmatprep.mubr.bf16.mxu0 %v360_v12  ;;  %328 = vmatprep.mubr.bf16.mxu1 %v361_v13 }
  0x2a   :  { %321 = vmatmul.mubr.bf16.gmra.mrb[4].mxu0 %v362_v14  ;;  %329 = vmatmul.mubr.bf16.gmra.mrb[4].mxu1 %v363_v15 }
  0xf5   :  { %v318_v17 = vpop.f32.mrb[0].mxu0  ;;  %v326_v18 = vpop.f32.mrb[0].mxu1 }
  0xf6   :  { %v193_v19 = vadd.f32 %v318_v17, %v267_v16  ;;  %v225_v20 = vadd.f32 %v326_v18, %v267_v16  ;;  %v184_v21 = vpop.f32.mrb[1].mxu0  ;;  %v216_v22 = vpop.f32.mrb[1].mxu1 }
  0xf7   :  { %v185_v23 = vadd.f32 %v267_v16, %v184_v21  ;;  %v217_v24 = vadd.f32 %v267_v16, %v216_v22  ;;  %v319_v25 = vpop.f32.mrb[2].mxu0  ;;  %v327_v26 = vpop.f32.mrb[2].mxu1 }
  0xf8   :  { %249 = vst [vmem:[%s486_s3 + $0x10] sm:$0xff] %v193_v19  ;;  %257 = vst [vmem:[%s486_s3 + $0x50] sm:$0xff] %v225_v20  ;;  %v196_v27 = vadd.f32 %v319_v25, %v267_v16  ;;  %v228_v28 = vadd.f32 %v327_v26, %v267_v16  ;;  %v187_v29 = vpop.f32.mrb[3].mxu0  ;;  %v219_v30 = vpop.f32.mrb[3].mxu1 }
  0xf9   :  { %247 = vst [vmem:[%s486_s3] sm:$0xff] %v185_v23  ;;  %255 = vst [vmem:[%s486_s3 + $0x40] sm:$0xff] %v217_v24  ;;  %v188_v31 = vadd.f32 %v267_v16, %v187_v29  ;;  %v220_v32 = vadd.f32 %v267_v16, %v219_v30 }
  0xfa   :  { %250 = vst [vmem:[%s486_s3 + $0x18] sm:$0xff] %v196_v27  ;;  %258 = vst [vmem:[%s486_s3 + $0x58] sm:$0xff] %v228_v28 }
  0xfb   :  { %248 = vst [vmem:[%s486_s3 + $0x8] sm:$0xff] %v188_v31  ;;  %256 = vst [vmem:[%s486_s3 + $0x48] sm:$0xff] %v220_v32 }
  0xfd   :  { %v322_v33 = vpop.f32.mrb[4].mxu0  ;;  %v330_v34 = vpop.f32.mrb[4].mxu1 }
  0xfe   :  { %v209_v35 = vadd.f32 %v322_v33, %v267_v16  ;;  %v241_v36 = vadd.f32 %v330_v34, %v267_v16  ;;  %v200_v37 = vpop.f32.mrb[5].mxu0  ;;  %v232_v38 = vpop.f32.mrb[5].mxu1 }
  0xff   :  { %v201_v39 = vadd.f32 %v267_v16, %v200_v37  ;;  %v233_v40 = vadd.f32 %v267_v16, %v232_v38  ;;  %v323_v41 = vpop.f32.mrb[6].mxu0  ;;  %v331_v42 = vpop.f32.mrb[6].mxu1 }
 0x100   :  { %253 = vst [vmem:[%s486_s3 + $0x30] sm:$0xff] %v209_v35  ;;  %261 = vst [vmem:[%s486_s3 + $0x70] sm:$0xff] %v241_v36  ;;  %v212_v43 = vadd.f32 %v323_v41, %v267_v16  ;;  %v244_v44 = vadd.f32 %v331_v42, %v267_v16  ;;  %v203_v45 = vpop.f32.mrb[7].mxu0  ;;  %v235_v46 = vpop.f32.mrb[7].mxu1 }
 0x101   :  { %251 = vst [vmem:[%s486_s3 + $0x20] sm:$0xff] %v201_v39  ;;  %259 = vst [vmem:[%s486_s3 + $0x60] sm:$0xff] %v233_v40  ;;  %v204_v47 = vadd.f32 %v267_v16, %v203_v45  ;;  %v236_v48 = vadd.f32 %v267_v16, %v235_v46 }
 0x102   :  { %254 = vst [vmem:[%s486_s3 + $0x38] sm:$0xff] %v212_v43  ;;  %262 = vst [vmem:[%s486_s3 + $0x78] sm:$0xff] %v244_v44 }
 0x103   :  { %252 = vst [vmem:[%s486_s3 + $0x28] sm:$0xff] %v204_v47  ;;  %260 = vst [vmem:[%s486_s3 + $0x68] sm:$0xff] %v236_v48 }

</bundles_post_ra>
